<compile_context>
chip_gen: v6e
topology: v6e:2x2x1
jax: 0.10.0
libtpu: 0.0.40
codegen_flags: <defaults>
</compile_context>

<pallas_src>
import jax
import jax.numpy as jnp
from jax import lax
from jax.experimental import pallas as pl
from jax.experimental.pallas import tpu as pltpu
import numpy as np

E = 32            # embedding_size
H = E // 2        # GRU hidden size per direction (16)
S = 8             # max tokens per tweet
T = 3             # tweets per user
VOCAB = 50
G6 = 6 * H        # fused gate width: [r_f r_b | z_f z_b | n_f n_b] = 96
WROWS, WCOLS = 2 * E, 128


def text_classifier_kernel(x_ref, mask_ref, w_ref, misc_ref, out_ref):
    """Single invocation (grid=()): fused bi-GRU over all tweets + classifier.

    x_ref    : (S*T, E)  token embeddings, row s*T + t == (tweet t, token s)
    mask_ref : (S, T, 2H) step-validity; fwd half gates token s, bwd half
               gates token S-1-s (emulates pack_padded_sequence)
    w_ref    : (64, 128) packed weights:
                 [0:E,   0:96 ] W_ih fused (gate-pair layout)
                 [E:2E,  0:96 ] W_hh fused (block-diag over directions)
                 [0:E,  96:128] W_c1      [E:2E, 96:98] W_c2
    misc_ref : (8, 128)  row0[:96]=b_ih  row1[:96]=b_hh  row2[:E]=b_c1
               row3[:2]=b_c2
    out_ref  : (1, 2) logits
    """
    w_ih = w_ref[0:E, 0:G6]                      # (32, 96)
    w_hh = w_ref[E:2 * E, 0:G6]                  # (32, 96)
    w_c1 = w_ref[0:E, G6:G6 + E]                 # (32, 32)
    w_c2 = w_ref[E:2 * E, G6:G6 + 2]             # (32, 2)
    b_ih = misc_ref[0:1, 0:G6]
    b_hh = misc_ref[1:2, 0:G6]
    b_c1 = misc_ref[2:3, 0:E]
    b_c2 = misc_ref[3:4, 0:2]

    # Hoisted input projection: every tweet / timestep / direction in one
    # lane-dense (24, 32) @ (32, 96) MXU call.
    gi = jnp.dot(x_ref[...], w_ih, preferred_element_type=jnp.float32) + b_ih

    # Within each 2H gate pair: first H columns = forward dir (token s),
    # last H columns = backward dir (token S-1-s).
    col = lax.broadcasted_iota(jnp.int32, (1, G6), 1)
    is_fwd = jnp.bitwise_and(col, 2 * H - 1) < H

    # Fused recurrence: one (3, 32) @ (32, 96) dot per step, fully unrolled.
    h = jnp.zeros((T, 2 * H), jnp.float32)       # [h_fwd | h_bwd] per tweet
    for s in range(S):
        gf = gi[s * T:(s + 1) * T, :]            # fwd gate inputs, token s
        gb = gi[(S - 1 - s) * T:(S - s) * T, :]  # bwd gate inputs, token S-1-s
        g_in = jnp.where(is_fwd, gf, gb)         # (T, 96)
        gh = jnp.dot(h, w_hh, preferred_element_type=jnp.float32) + b_hh
        r = jax.nn.sigmoid(g_in[:, 0:2 * H] + gh[:, 0:2 * H])
        z = jax.nn.sigmoid(g_in[:, 2 * H:4 * H] + gh[:, 2 * H:4 * H])
        n = jnp.tanh(g_in[:, 4 * H:6 * H] + r * gh[:, 4 * H:6 * H])
        upd = mask_ref[s] * (1.0 - z)            # padded steps: h unchanged
        h = h + upd * (n - h)                    # == (1-z)*n + z*h when valid

    # h[t] == torch.cat([h_fwd_final, h_bwd_final], -1); mean over tweets
    feat = jnp.mean(h, axis=0, keepdims=True)                        # (1, E)
    h1 = jnp.maximum(
        jnp.dot(feat, w_c1, preferred_element_type=jnp.float32) + b_c1, 0.0)
    out_ref[...] = (jnp.dot(h1, w_c2, preferred_element_type=jnp.float32)
                    + b_c2)


def make_params(key):
    ks = jax.random.split(key, 13)

    def rnd(k, shape, scale=0.1):
        return scale * jax.random.normal(k, shape, dtype=jnp.float32)

    emb = rnd(ks[0], (VOCAB + 2, E))
    emb = emb.at[VOCAB + 1].set(0.0)             # padding_idx row is zero
    return dict(
        emb=emb,
        # bi-GRU, gate order (r, z, n), stored transposed as (in, 3H)
        w_ih_f=rnd(ks[1], (E, 3 * H)), w_hh_f=rnd(ks[2], (H, 3 * H)),
        b_ih_f=rnd(ks[3], (3 * H,)),   b_hh_f=rnd(ks[4], (3 * H,)),
        w_ih_b=rnd(ks[5], (E, 3 * H)), w_hh_b=rnd(ks[6], (H, 3 * H)),
        b_ih_b=rnd(ks[7], (3 * H,)),   b_hh_b=rnd(ks[8], (3 * H,)),
        w_c1=rnd(ks[9], (E, E)), b_c1=rnd(ks[10], (E,)),
        w_c2=rnd(ks[11], (E, 2)), b_c2=rnd(ks[12], (2,)),
    )


def pack_params(p):
    """Pack all weights/biases into two VMEM-friendly slabs (2 DMAs total)."""
    w = np.zeros((WROWS, WCOLS), np.float32)
    b_ih = np.zeros((G6,), np.float32)
    b_hh = np.zeros((G6,), np.float32)
    for g in range(3):                                    # gate-pair columns
        fc = slice(g * 2 * H, g * 2 * H + H)              # fwd cols of gate g
        bc = slice(g * 2 * H + H, (g + 1) * 2 * H)        # bwd cols of gate g
        gs = slice(g * H, (g + 1) * H)
        w[0:E, fc] = np.asarray(p['w_ih_f'][:, gs])
        w[0:E, bc] = np.asarray(p['w_ih_b'][:, gs])
        w[E:E + H, fc] = np.asarray(p['w_hh_f'][:, gs])       # h_f -> fwd cols
        w[E + H:2 * E, bc] = np.asarray(p['w_hh_b'][:, gs])   # h_b -> bwd cols
        b_ih[fc] = np.asarray(p['b_ih_f'][gs])
        b_ih[bc] = np.asarray(p['b_ih_b'][gs])
        b_hh[fc] = np.asarray(p['b_hh_f'][gs])
        b_hh[bc] = np.asarray(p['b_hh_b'][gs])
    w[0:E, G6:G6 + E] = np.asarray(p['w_c1'])
    w[E:2 * E, G6:G6 + 2] = np.asarray(p['w_c2'])

    misc = np.zeros((8, WCOLS), np.float32)
    misc[0, 0:G6] = b_ih
    misc[1, 0:G6] = b_hh
    misc[2, 0:E] = np.asarray(p['b_c1'])
    misc[3, 0:2] = np.asarray(p['b_c2'])
    return jnp.asarray(w), jnp.asarray(misc)


@jax.jit
def text_classifier_forward(ids, lengths, emb, w_slab, misc_slab):
    # XLA glue: embedding gather + packed-sequence validity mask.
    x = emb[ids]                                            # (T, S, E)
    x_st = jnp.transpose(x, (1, 0, 2)).reshape(S * T, E)    # row s*T + t
    steps = jnp.arange(S)
    valid = (steps[None, :] < lengths[:, None]).astype(jnp.float32)   # (T, S)
    vf = jnp.transpose(valid)[:, :, None]                   # token s
    vb = jnp.transpose(valid[:, ::-1])[:, :, None]          # token S-1-s
    mask = jnp.concatenate([jnp.broadcast_to(vf, (S, T, H)),
                            jnp.broadcast_to(vb, (S, T, H))], axis=-1)

    return pl.pallas_call(
        text_classifier_kernel,
        out_shape=jax.ShapeDtypeStruct((1, 2), jnp.float32),
        in_specs=[pl.BlockSpec(memory_space=pltpu.MemorySpace.VMEM)] * 4,
        out_specs=pl.BlockSpec(memory_space=pltpu.MemorySpace.VMEM),
    )(x_st, mask, w_slab, misc_slab)


# ---------------- pure-JAX reference (unfused weights) ----------------
def _gru_dir_ref(x_seq, w_ih, w_hh, b_ih, b_hh):
    h = jnp.zeros((1, H), jnp.float32)
    for s in range(x_seq.shape[0]):
        gi = x_seq[s:s + 1] @ w_ih + b_ih
        gh = h @ w_hh + b_hh
        r = jax.nn.sigmoid(gi[:, 0:H] + gh[:, 0:H])
        z = jax.nn.sigmoid(gi[:, H:2 * H] + gh[:, H:2 * H])
        n = jnp.tanh(gi[:, 2 * H:3 * H] + r * gh[:, 2 * H:3 * H])
        h = (1.0 - z) * n + z * h
    return h


def text_classifier_reference(ids_np, lengths_py, p):
    feats = []
    for t in range(T):
        L = int(lengths_py[t])
        x = p['emb'][ids_np[t, :L]]                         # packed: no padding
        h_f = _gru_dir_ref(x, p['w_ih_f'], p['w_hh_f'], p['b_ih_f'], p['b_hh_f'])
        h_b = _gru_dir_ref(x[::-1], p['w_ih_b'], p['w_hh_b'],
                           p['b_ih_b'], p['b_hh_b'])
        feats.append(jnp.concatenate([h_f, h_b], axis=1))
    user_feat = jnp.mean(jnp.concatenate(feats, axis=0), axis=0, keepdims=True)
    h1 = jnp.maximum(user_feat @ p['w_c1'] + p['b_c1'], 0.0)
    return h1 @ p['w_c2'] + p['b_c2']


if __name__ == "__main__":
    key = jax.random.PRNGKey(0)
    kp, kid = jax.random.split(key, 2)
    params = make_params(kp)
    w_slab, misc_slab = pack_params(params)

    lengths_py = [8, 5, 3]                                  # variable lengths
    ids_np = np.array(jax.random.randint(kid, (T, S), 0, VOCAB + 1))
    for t, L in enumerate(lengths_py):
        ids_np[t, L:] = VOCAB + 1                           # padding_idx
    ids = jnp.asarray(ids_np, dtype=jnp.int32)
    lengths = jnp.asarray(lengths_py, dtype=jnp.int32)

    out = text_classifier_forward(ids, lengths, params['emb'],
                                  w_slab, misc_slab)
    jax.block_until_ready(out)
    assert out.shape == (1, 2)

    ref = text_classifier_reference(ids_np, lengths_py, params)
    np.testing.assert_allclose(np.asarray(out), np.asarray(ref),
                               atol=2e-3, rtol=2e-3)
    print("KERNEL_OK")
</pallas_src>

<mosaic_0001>
module attributes {stable_mosaic.version = 11 : i64} {
  func.func @text_classifier_kernel(%arg0: memref<24x32xf32, #tpu.memory_space<vmem>>, %arg1: memref<8x3x32xf32, #tpu.memory_space<vmem>>, %arg2: memref<64x128xf32, #tpu.memory_space<vmem>>, %arg3: memref<8x128xf32, #tpu.memory_space<vmem>>, %arg4: memref<1x2xf32, #tpu.memory_space<vmem>>) attributes {dimension_semantics = [], scalar_prefetch = 0 : i64, scratch_operands = 0 : i64, tpu.core_type = #tpu.core_type<tc>} {
    %c0 = arith.constant 0 : index
    %c0_0 = arith.constant 0 : index
    %0 = vector.load %arg2[%c0, %c0_0] : memref<64x128xf32, #tpu.memory_space<vmem>>, vector<32x96xf32>
    %c32 = arith.constant 32 : index
    %c0_1 = arith.constant 0 : index
    %1 = vector.load %arg2[%c32, %c0_1] : memref<64x128xf32, #tpu.memory_space<vmem>>, vector<32x96xf32>
    %c0_2 = arith.constant 0 : index
    %c96 = arith.constant 96 : index
    %2 = vector.load %arg2[%c0_2, %c96] : memref<64x128xf32, #tpu.memory_space<vmem>>, vector<32x32xf32>
    %c32_3 = arith.constant 32 : index
    %c96_4 = arith.constant 96 : index
    %3 = vector.load %arg2[%c32_3, %c96_4] : memref<64x128xf32, #tpu.memory_space<vmem>>, vector<32x2xf32>
    %c0_5 = arith.constant 0 : index
    %c0_6 = arith.constant 0 : index
    %4 = vector.load %arg3[%c0_5, %c0_6] : memref<8x128xf32, #tpu.memory_space<vmem>>, vector<1x96xf32>
    %c1 = arith.constant 1 : index
    %c0_7 = arith.constant 0 : index
    %5 = vector.load %arg3[%c1, %c0_7] : memref<8x128xf32, #tpu.memory_space<vmem>>, vector<1x96xf32>
    %c2 = arith.constant 2 : index
    %c0_8 = arith.constant 0 : index
    %6 = vector.load %arg3[%c2, %c0_8] : memref<8x128xf32, #tpu.memory_space<vmem>>, vector<1x32xf32>
    %c3 = arith.constant 3 : index
    %c0_9 = arith.constant 0 : index
    %7 = vector.load %arg3[%c3, %c0_9] : memref<8x128xf32, #tpu.memory_space<vmem>>, vector<1x2xf32>
    %c0_10 = arith.constant 0 : index
    %c0_11 = arith.constant 0 : index
    %8 = vector.load %arg0[%c0_10, %c0_11] : memref<24x32xf32, #tpu.memory_space<vmem>>, vector<24x32xf32>
    %cst = arith.constant dense<0.000000e+00> : vector<24x96xf32>
    %9 = tpu.matmul %8, %0, %cst {dimension_numbers = #tpu.dot_dimension_numbers<[1], [0], [0], [1], [0, 0, 1, 1], [], []>} : vector<24x32xf32>, vector<32x96xf32>, vector<24x96xf32> -> vector<24x96xf32>
    %10 = vector.broadcast %4 : vector<1x96xf32> to vector<24x96xf32>
    %11 = arith.addf %9, %10 : vector<24x96xf32>
    %12 = tpu.iota {dimensions = array<i32: 1>} : vector<1x96xi32>
    %c31_i32 = arith.constant 31 : i32
    %13 = vector.broadcast %c31_i32 : i32 to vector<1x96xi32>
    %14 = arith.andi %12, %13 : vector<1x96xi32>
    %c16_i32 = arith.constant 16 : i32
    %15 = vector.broadcast %c16_i32 : i32 to vector<1x96xi32>
    %16 = arith.cmpi slt, %14, %15 : vector<1x96xi32>
    %cst_12 = arith.constant 0.000000e+00 : f32
    %17 = vector.broadcast %cst_12 : f32 to vector<3x32xf32>
    %18 = vector.extract_strided_slice %11 {offsets = [0, 0], sizes = [3, 96], strides = [1, 1]} : vector<24x96xf32> to vector<3x96xf32>
    %19 = vector.extract_strided_slice %11 {offsets = [21, 0], sizes = [3, 96], strides = [1, 1]} : vector<24x96xf32> to vector<3x96xf32>
    %20 = vector.shape_cast %16 : vector<1x96xi1> to vector<1x96xi1>
    %21 = vector.broadcast %20 : vector<1x96xi1> to vector<3x96xi1>
    %22 = arith.select %21, %18, %19 : vector<3x96xi1>, vector<3x96xf32>
    %cst_13 = arith.constant dense<0.000000e+00> : vector<3x96xf32>
    %23 = tpu.matmul %17, %1, %cst_13 {dimension_numbers = #tpu.dot_dimension_numbers<[1], [0], [0], [1], [0, 0, 1, 1], [], []>} : vector<3x32xf32>, vector<32x96xf32>, vector<3x96xf32> -> vector<3x96xf32>
    %24 = vector.broadcast %5 : vector<1x96xf32> to vector<3x96xf32>
    %25 = arith.addf %23, %24 : vector<3x96xf32>
    %26 = vector.extract_strided_slice %22 {offsets = [0, 0], sizes = [3, 32], strides = [1, 1]} : vector<3x96xf32> to vector<3x32xf32>
    %27 = vector.extract_strided_slice %25 {offsets = [0, 0], sizes = [3, 32], strides = [1, 1]} : vector<3x96xf32> to vector<3x32xf32>
    %28 = arith.addf %26, %27 : vector<3x32xf32>
    %29 = arith.negf %28 : vector<3x32xf32>
    %30 = math.exp %29 : vector<3x32xf32>
    %cst_14 = arith.constant 1.000000e+00 : f32
    %31 = vector.broadcast %cst_14 : f32 to vector<3x32xf32>
    %32 = arith.addf %31, %30 : vector<3x32xf32>
    %33 = arith.divf %31, %32 : vector<3x32xf32>
    %34 = vector.extract_strided_slice %22 {offsets = [0, 32], sizes = [3, 32], strides = [1, 1]} : vector<3x96xf32> to vector<3x32xf32>
    %35 = vector.extract_strided_slice %25 {offsets = [0, 32], sizes = [3, 32], strides = [1, 1]} : vector<3x96xf32> to vector<3x32xf32>
    %36 = arith.addf %34, %35 : vector<3x32xf32>
    %37 = arith.negf %36 : vector<3x32xf32>
    %38 = math.exp %37 : vector<3x32xf32>
    %cst_15 = arith.constant 1.000000e+00 : f32
    %39 = vector.broadcast %cst_15 : f32 to vector<3x32xf32>
    %40 = arith.addf %39, %38 : vector<3x32xf32>
    %41 = arith.divf %39, %40 : vector<3x32xf32>
    %42 = vector.extract_strided_slice %22 {offsets = [0, 64], sizes = [3, 32], strides = [1, 1]} : vector<3x96xf32> to vector<3x32xf32>
    %43 = vector.extract_strided_slice %25 {offsets = [0, 64], sizes = [3, 32], strides = [1, 1]} : vector<3x96xf32> to vector<3x32xf32>
    %44 = arith.mulf %33, %43 : vector<3x32xf32>
    %45 = arith.addf %42, %44 : vector<3x32xf32>
    %46 = math.tanh %45 : vector<3x32xf32>
    %c0_16 = arith.constant 0 : index
    %c0_17 = arith.constant 0 : index
    %c0_18 = arith.constant 0 : index
    %47 = vector.load %arg1[%c0_16, %c0_17, %c0_18] : memref<8x3x32xf32, #tpu.memory_space<vmem>>, vector<1x3x32xf32>
    %48 = vector.shape_cast %47 : vector<1x3x32xf32> to vector<3x32xf32>
    %cst_19 = arith.constant 1.000000e+00 : f32
    %49 = vector.broadcast %cst_19 : f32 to vector<3x32xf32>
    %50 = arith.subf %49, %41 : vector<3x32xf32>
    %51 = arith.mulf %48, %50 : vector<3x32xf32>
    %52 = arith.subf %46, %17 : vector<3x32xf32>
    %53 = arith.mulf %51, %52 : vector<3x32xf32>
    %54 = arith.addf %17, %53 : vector<3x32xf32>
    %55 = vector.extract_strided_slice %11 {offsets = [3, 0], sizes = [3, 96], strides = [1, 1]} : vector<24x96xf32> to vector<3x96xf32>
    %56 = vector.extract_strided_slice %11 {offsets = [18, 0], sizes = [3, 96], strides = [1, 1]} : vector<24x96xf32> to vector<3x96xf32>
    %57 = vector.shape_cast %16 : vector<1x96xi1> to vector<1x96xi1>
    %58 = vector.broadcast %57 : vector<1x96xi1> to vector<3x96xi1>
    %59 = arith.select %58, %55, %56 : vector<3x96xi1>, vector<3x96xf32>
    %cst_20 = arith.constant dense<0.000000e+00> : vector<3x96xf32>
    %60 = tpu.matmul %54, %1, %cst_20 {dimension_numbers = #tpu.dot_dimension_numbers<[1], [0], [0], [1], [0, 0, 1, 1], [], []>} : vector<3x32xf32>, vector<32x96xf32>, vector<3x96xf32> -> vector<3x96xf32>
    %61 = vector.broadcast %5 : vector<1x96xf32> to vector<3x96xf32>
    %62 = arith.addf %60, %61 : vector<3x96xf32>
    %63 = vector.extract_strided_slice %59 {offsets = [0, 0], sizes = [3, 32], strides = [1, 1]} : vector<3x96xf32> to vector<3x32xf32>
    %64 = vector.extract_strided_slice %62 {offsets = [0, 0], sizes = [3, 32], strides = [1, 1]} : vector<3x96xf32> to vector<3x32xf32>
    %65 = arith.addf %63, %64 : vector<3x32xf32>
    %66 = arith.negf %65 : vector<3x32xf32>
    %67 = math.exp %66 : vector<3x32xf32>
    %cst_21 = arith.constant 1.000000e+00 : f32
    %68 = vector.broadcast %cst_21 : f32 to vector<3x32xf32>
    %69 = arith.addf %68, %67 : vector<3x32xf32>
    %70 = arith.divf %68, %69 : vector<3x32xf32>
    %71 = vector.extract_strided_slice %59 {offsets = [0, 32], sizes = [3, 32], strides = [1, 1]} : vector<3x96xf32> to vector<3x32xf32>
    %72 = vector.extract_strided_slice %62 {offsets = [0, 32], sizes = [3, 32], strides = [1, 1]} : vector<3x96xf32> to vector<3x32xf32>
    %73 = arith.addf %71, %72 : vector<3x32xf32>
    %74 = arith.negf %73 : vector<3x32xf32>
    %75 = math.exp %74 : vector<3x32xf32>
    %cst_22 = arith.constant 1.000000e+00 : f32
    %76 = vector.broadcast %cst_22 : f32 to vector<3x32xf32>
    %77 = arith.addf %76, %75 : vector<3x32xf32>
    %78 = arith.divf %76, %77 : vector<3x32xf32>
    %79 = vector.extract_strided_slice %59 {offsets = [0, 64], sizes = [3, 32], strides = [1, 1]} : vector<3x96xf32> to vector<3x32xf32>
    %80 = vector.extract_strided_slice %62 {offsets = [0, 64], sizes = [3, 32], strides = [1, 1]} : vector<3x96xf32> to vector<3x32xf32>
    %81 = arith.mulf %70, %80 : vector<3x32xf32>
    %82 = arith.addf %79, %81 : vector<3x32xf32>
    %83 = math.tanh %82 : vector<3x32xf32>
    %c1_23 = arith.constant 1 : index
    %c0_24 = arith.constant 0 : index
    %c0_25 = arith.constant 0 : index
    %84 = vector.load %arg1[%c1_23, %c0_24, %c0_25] : memref<8x3x32xf32, #tpu.memory_space<vmem>>, vector<1x3x32xf32>
    %85 = vector.shape_cast %84 : vector<1x3x32xf32> to vector<3x32xf32>
    %cst_26 = arith.constant 1.000000e+00 : f32
    %86 = vector.broadcast %cst_26 : f32 to vector<3x32xf32>
    %87 = arith.subf %86, %78 : vector<3x32xf32>
    %88 = arith.mulf %85, %87 : vector<3x32xf32>
    %89 = arith.subf %83, %54 : vector<3x32xf32>
    %90 = arith.mulf %88, %89 : vector<3x32xf32>
    %91 = arith.addf %54, %90 : vector<3x32xf32>
    %92 = vector.extract_strided_slice %11 {offsets = [6, 0], sizes = [3, 96], strides = [1, 1]} : vector<24x96xf32> to vector<3x96xf32>
    %93 = vector.extract_strided_slice %11 {offsets = [15, 0], sizes = [3, 96], strides = [1, 1]} : vector<24x96xf32> to vector<3x96xf32>
    %94 = vector.shape_cast %16 : vector<1x96xi1> to vector<1x96xi1>
    %95 = vector.broadcast %94 : vector<1x96xi1> to vector<3x96xi1>
    %96 = arith.select %95, %92, %93 : vector<3x96xi1>, vector<3x96xf32>
    %cst_27 = arith.constant dense<0.000000e+00> : vector<3x96xf32>
    %97 = tpu.matmul %91, %1, %cst_27 {dimension_numbers = #tpu.dot_dimension_numbers<[1], [0], [0], [1], [0, 0, 1, 1], [], []>} : vector<3x32xf32>, vector<32x96xf32>, vector<3x96xf32> -> vector<3x96xf32>
    %98 = vector.broadcast %5 : vector<1x96xf32> to vector<3x96xf32>
    %99 = arith.addf %97, %98 : vector<3x96xf32>
    %100 = vector.extract_strided_slice %96 {offsets = [0, 0], sizes = [3, 32], strides = [1, 1]} : vector<3x96xf32> to vector<3x32xf32>
    %101 = vector.extract_strided_slice %99 {offsets = [0, 0], sizes = [3, 32], strides = [1, 1]} : vector<3x96xf32> to vector<3x32xf32>
    %102 = arith.addf %100, %101 : vector<3x32xf32>
    %103 = arith.negf %102 : vector<3x32xf32>
    %104 = math.exp %103 : vector<3x32xf32>
    %cst_28 = arith.constant 1.000000e+00 : f32
    %105 = vector.broadcast %cst_28 : f32 to vector<3x32xf32>
    %106 = arith.addf %105, %104 : vector<3x32xf32>
    %107 = arith.divf %105, %106 : vector<3x32xf32>
    %108 = vector.extract_strided_slice %96 {offsets = [0, 32], sizes = [3, 32], strides = [1, 1]} : vector<3x96xf32> to vector<3x32xf32>
    %109 = vector.extract_strided_slice %99 {offsets = [0, 32], sizes = [3, 32], strides = [1, 1]} : vector<3x96xf32> to vector<3x32xf32>
    %110 = arith.addf %108, %109 : vector<3x32xf32>
    %111 = arith.negf %110 : vector<3x32xf32>
    %112 = math.exp %111 : vector<3x32xf32>
    %cst_29 = arith.constant 1.000000e+00 : f32
    %113 = vector.broadcast %cst_29 : f32 to vector<3x32xf32>
    %114 = arith.addf %113, %112 : vector<3x32xf32>
    %115 = arith.divf %113, %114 : vector<3x32xf32>
    %116 = vector.extract_strided_slice %96 {offsets = [0, 64], sizes = [3, 32], strides = [1, 1]} : vector<3x96xf32> to vector<3x32xf32>
    %117 = vector.extract_strided_slice %99 {offsets = [0, 64], sizes = [3, 32], strides = [1, 1]} : vector<3x96xf32> to vector<3x32xf32>
    %118 = arith.mulf %107, %117 : vector<3x32xf32>
    %119 = arith.addf %116, %118 : vector<3x32xf32>
    %120 = math.tanh %119 : vector<3x32xf32>
    %c2_30 = arith.constant 2 : index
    %c0_31 = arith.constant 0 : index
    %c0_32 = arith.constant 0 : index
    %121 = vector.load %arg1[%c2_30, %c0_31, %c0_32] : memref<8x3x32xf32, #tpu.memory_space<vmem>>, vector<1x3x32xf32>
    %122 = vector.shape_cast %121 : vector<1x3x32xf32> to vector<3x32xf32>
    %cst_33 = arith.constant 1.000000e+00 : f32
    %123 = vector.broadcast %cst_33 : f32 to vector<3x32xf32>
    %124 = arith.subf %123, %115 : vector<3x32xf32>
    %125 = arith.mulf %122, %124 : vector<3x32xf32>
    %126 = arith.subf %120, %91 : vector<3x32xf32>
    %127 = arith.mulf %125, %126 : vector<3x32xf32>
    %128 = arith.addf %91, %127 : vector<3x32xf32>
    %129 = vector.extract_strided_slice %11 {offsets = [9, 0], sizes = [3, 96], strides = [1, 1]} : vector<24x96xf32> to vector<3x96xf32>
    %130 = vector.extract_strided_slice %11 {offsets = [12, 0], sizes = [3, 96], strides = [1, 1]} : vector<24x96xf32> to vector<3x96xf32>
    %131 = vector.shape_cast %16 : vector<1x96xi1> to vector<1x96xi1>
    %132 = vector.broadcast %131 : vector<1x96xi1> to vector<3x96xi1>
    %133 = arith.select %132, %129, %130 : vector<3x96xi1>, vector<3x96xf32>
    %cst_34 = arith.constant dense<0.000000e+00> : vector<3x96xf32>
    %134 = tpu.matmul %128, %1, %cst_34 {dimension_numbers = #tpu.dot_dimension_numbers<[1], [0], [0], [1], [0, 0, 1, 1], [], []>} : vector<3x32xf32>, vector<32x96xf32>, vector<3x96xf32> -> vector<3x96xf32>
    %135 = vector.broadcast %5 : vector<1x96xf32> to vector<3x96xf32>
    %136 = arith.addf %134, %135 : vector<3x96xf32>
    %137 = vector.extract_strided_slice %133 {offsets = [0, 0], sizes = [3, 32], strides = [1, 1]} : vector<3x96xf32> to vector<3x32xf32>
    %138 = vector.extract_strided_slice %136 {offsets = [0, 0], sizes = [3, 32], strides = [1, 1]} : vector<3x96xf32> to vector<3x32xf32>
    %139 = arith.addf %137, %138 : vector<3x32xf32>
    %140 = arith.negf %139 : vector<3x32xf32>
    %141 = math.exp %140 : vector<3x32xf32>
    %cst_35 = arith.constant 1.000000e+00 : f32
    %142 = vector.broadcast %cst_35 : f32 to vector<3x32xf32>
    %143 = arith.addf %142, %141 : vector<3x32xf32>
    %144 = arith.divf %142, %143 : vector<3x32xf32>
    %145 = vector.extract_strided_slice %133 {offsets = [0, 32], sizes = [3, 32], strides = [1, 1]} : vector<3x96xf32> to vector<3x32xf32>
    %146 = vector.extract_strided_slice %136 {offsets = [0, 32], sizes = [3, 32], strides = [1, 1]} : vector<3x96xf32> to vector<3x32xf32>
    %147 = arith.addf %145, %146 : vector<3x32xf32>
    %148 = arith.negf %147 : vector<3x32xf32>
    %149 = math.exp %148 : vector<3x32xf32>
    %cst_36 = arith.constant 1.000000e+00 : f32
    %150 = vector.broadcast %cst_36 : f32 to vector<3x32xf32>
    %151 = arith.addf %150, %149 : vector<3x32xf32>
    %152 = arith.divf %150, %151 : vector<3x32xf32>
    %153 = vector.extract_strided_slice %133 {offsets = [0, 64], sizes = [3, 32], strides = [1, 1]} : vector<3x96xf32> to vector<3x32xf32>
    %154 = vector.extract_strided_slice %136 {offsets = [0, 64], sizes = [3, 32], strides = [1, 1]} : vector<3x96xf32> to vector<3x32xf32>
    %155 = arith.mulf %144, %154 : vector<3x32xf32>
    %156 = arith.addf %153, %155 : vector<3x32xf32>
    %157 = math.tanh %156 : vector<3x32xf32>
    %c3_37 = arith.constant 3 : index
    %c0_38 = arith.constant 0 : index
    %c0_39 = arith.constant 0 : index
    %158 = vector.load %arg1[%c3_37, %c0_38, %c0_39] : memref<8x3x32xf32, #tpu.memory_space<vmem>>, vector<1x3x32xf32>
    %159 = vector.shape_cast %158 : vector<1x3x32xf32> to vector<3x32xf32>
    %cst_40 = arith.constant 1.000000e+00 : f32
    %160 = vector.broadcast %cst_40 : f32 to vector<3x32xf32>
    %161 = arith.subf %160, %152 : vector<3x32xf32>
    %162 = arith.mulf %159, %161 : vector<3x32xf32>
    %163 = arith.subf %157, %128 : vector<3x32xf32>
    %164 = arith.mulf %162, %163 : vector<3x32xf32>
    %165 = arith.addf %128, %164 : vector<3x32xf32>
    %166 = vector.extract_strided_slice %11 {offsets = [12, 0], sizes = [3, 96], strides = [1, 1]} : vector<24x96xf32> to vector<3x96xf32>
    %167 = vector.extract_strided_slice %11 {offsets = [9, 0], sizes = [3, 96], strides = [1, 1]} : vector<24x96xf32> to vector<3x96xf32>
    %168 = vector.shape_cast %16 : vector<1x96xi1> to vector<1x96xi1>
    %169 = vector.broadcast %168 : vector<1x96xi1> to vector<3x96xi1>
    %170 = arith.select %169, %166, %167 : vector<3x96xi1>, vector<3x96xf32>
    %cst_41 = arith.constant dense<0.000000e+00> : vector<3x96xf32>
    %171 = tpu.matmul %165, %1, %cst_41 {dimension_numbers = #tpu.dot_dimension_numbers<[1], [0], [0], [1], [0, 0, 1, 1], [], []>} : vector<3x32xf32>, vector<32x96xf32>, vector<3x96xf32> -> vector<3x96xf32>
    %172 = vector.broadcast %5 : vector<1x96xf32> to vector<3x96xf32>
    %173 = arith.addf %171, %172 : vector<3x96xf32>
    %174 = vector.extract_strided_slice %170 {offsets = [0, 0], sizes = [3, 32], strides = [1, 1]} : vector<3x96xf32> to vector<3x32xf32>
    %175 = vector.extract_strided_slice %173 {offsets = [0, 0], sizes = [3, 32], strides = [1, 1]} : vector<3x96xf32> to vector<3x32xf32>
    %176 = arith.addf %174, %175 : vector<3x32xf32>
    %177 = arith.negf %176 : vector<3x32xf32>
    %178 = math.exp %177 : vector<3x32xf32>
    %cst_42 = arith.constant 1.000000e+00 : f32
    %179 = vector.broadcast %cst_42 : f32 to vector<3x32xf32>
    %180 = arith.addf %179, %178 : vector<3x32xf32>
    %181 = arith.divf %179, %180 : vector<3x32xf32>
    %182 = vector.extract_strided_slice %170 {offsets = [0, 32], sizes = [3, 32], strides = [1, 1]} : vector<3x96xf32> to vector<3x32xf32>
    %183 = vector.extract_strided_slice %173 {offsets = [0, 32], sizes = [3, 32], strides = [1, 1]} : vector<3x96xf32> to vector<3x32xf32>
    %184 = arith.addf %182, %183 : vector<3x32xf32>
    %185 = arith.negf %184 : vector<3x32xf32>
    %186 = math.exp %185 : vector<3x32xf32>
    %cst_43 = arith.constant 1.000000e+00 : f32
    %187 = vector.broadcast %cst_43 : f32 to vector<3x32xf32>
    %188 = arith.addf %187, %186 : vector<3x32xf32>
    %189 = arith.divf %187, %188 : vector<3x32xf32>
    %190 = vector.extract_strided_slice %170 {offsets = [0, 64], sizes = [3, 32], strides = [1, 1]} : vector<3x96xf32> to vector<3x32xf32>
    %191 = vector.extract_strided_slice %173 {offsets = [0, 64], sizes = [3, 32], strides = [1, 1]} : vector<3x96xf32> to vector<3x32xf32>
    %192 = arith.mulf %181, %191 : vector<3x32xf32>
    %193 = arith.addf %190, %192 : vector<3x32xf32>
    %194 = math.tanh %193 : vector<3x32xf32>
    %c4 = arith.constant 4 : index
    %c0_44 = arith.constant 0 : index
    %c0_45 = arith.constant 0 : index
    %195 = vector.load %arg1[%c4, %c0_44, %c0_45] : memref<8x3x32xf32, #tpu.memory_space<vmem>>, vector<1x3x32xf32>
    %196 = vector.shape_cast %195 : vector<1x3x32xf32> to vector<3x32xf32>
    %cst_46 = arith.constant 1.000000e+00 : f32
    %197 = vector.broadcast %cst_46 : f32 to vector<3x32xf32>
    %198 = arith.subf %197, %189 : vector<3x32xf32>
    %199 = arith.mulf %196, %198 : vector<3x32xf32>
    %200 = arith.subf %194, %165 : vector<3x32xf32>
    %201 = arith.mulf %199, %200 : vector<3x32xf32>
    %202 = arith.addf %165, %201 : vector<3x32xf32>
    %203 = vector.extract_strided_slice %11 {offsets = [15, 0], sizes = [3, 96], strides = [1, 1]} : vector<24x96xf32> to vector<3x96xf32>
    %204 = vector.extract_strided_slice %11 {offsets = [6, 0], sizes = [3, 96], strides = [1, 1]} : vector<24x96xf32> to vector<3x96xf32>
    %205 = vector.shape_cast %16 : vector<1x96xi1> to vector<1x96xi1>
    %206 = vector.broadcast %205 : vector<1x96xi1> to vector<3x96xi1>
    %207 = arith.select %206, %203, %204 : vector<3x96xi1>, vector<3x96xf32>
    %cst_47 = arith.constant dense<0.000000e+00> : vector<3x96xf32>
    %208 = tpu.matmul %202, %1, %cst_47 {dimension_numbers = #tpu.dot_dimension_numbers<[1], [0], [0], [1], [0, 0, 1, 1], [], []>} : vector<3x32xf32>, vector<32x96xf32>, vector<3x96xf32> -> vector<3x96xf32>
    %209 = vector.broadcast %5 : vector<1x96xf32> to vector<3x96xf32>
    %210 = arith.addf %208, %209 : vector<3x96xf32>
    %211 = vector.extract_strided_slice %207 {offsets = [0, 0], sizes = [3, 32], strides = [1, 1]} : vector<3x96xf32> to vector<3x32xf32>
    %212 = vector.extract_strided_slice %210 {offsets = [0, 0], sizes = [3, 32], strides = [1, 1]} : vector<3x96xf32> to vector<3x32xf32>
    %213 = arith.addf %211, %212 : vector<3x32xf32>
    %214 = arith.negf %213 : vector<3x32xf32>
    %215 = math.exp %214 : vector<3x32xf32>
    %cst_48 = arith.constant 1.000000e+00 : f32
    %216 = vector.broadcast %cst_48 : f32 to vector<3x32xf32>
    %217 = arith.addf %216, %215 : vector<3x32xf32>
    %218 = arith.divf %216, %217 : vector<3x32xf32>
    %219 = vector.extract_strided_slice %207 {offsets = [0, 32], sizes = [3, 32], strides = [1, 1]} : vector<3x96xf32> to vector<3x32xf32>
    %220 = vector.extract_strided_slice %210 {offsets = [0, 32], sizes = [3, 32], strides = [1, 1]} : vector<3x96xf32> to vector<3x32xf32>
    %221 = arith.addf %219, %220 : vector<3x32xf32>
    %222 = arith.negf %221 : vector<3x32xf32>
    %223 = math.exp %222 : vector<3x32xf32>
    %cst_49 = arith.constant 1.000000e+00 : f32
    %224 = vector.broadcast %cst_49 : f32 to vector<3x32xf32>
    %225 = arith.addf %224, %223 : vector<3x32xf32>
    %226 = arith.divf %224, %225 : vector<3x32xf32>
    %227 = vector.extract_strided_slice %207 {offsets = [0, 64], sizes = [3, 32], strides = [1, 1]} : vector<3x96xf32> to vector<3x32xf32>
    %228 = vector.extract_strided_slice %210 {offsets = [0, 64], sizes = [3, 32], strides = [1, 1]} : vector<3x96xf32> to vector<3x32xf32>
    %229 = arith.mulf %218, %228 : vector<3x32xf32>
    %230 = arith.addf %227, %229 : vector<3x32xf32>
    %231 = math.tanh %230 : vector<3x32xf32>
    %c5 = arith.constant 5 : index
    %c0_50 = arith.constant 0 : index
    %c0_51 = arith.constant 0 : index
    %232 = vector.load %arg1[%c5, %c0_50, %c0_51] : memref<8x3x32xf32, #tpu.memory_space<vmem>>, vector<1x3x32xf32>
    %233 = vector.shape_cast %232 : vector<1x3x32xf32> to vector<3x32xf32>
    %cst_52 = arith.constant 1.000000e+00 : f32
    %234 = vector.broadcast %cst_52 : f32 to vector<3x32xf32>
    %235 = arith.subf %234, %226 : vector<3x32xf32>
    %236 = arith.mulf %233, %235 : vector<3x32xf32>
    %237 = arith.subf %231, %202 : vector<3x32xf32>
    %238 = arith.mulf %236, %237 : vector<3x32xf32>
    %239 = arith.addf %202, %238 : vector<3x32xf32>
    %240 = vector.extract_strided_slice %11 {offsets = [18, 0], sizes = [3, 96], strides = [1, 1]} : vector<24x96xf32> to vector<3x96xf32>
    %241 = vector.extract_strided_slice %11 {offsets = [3, 0], sizes = [3, 96], strides = [1, 1]} : vector<24x96xf32> to vector<3x96xf32>
    %242 = vector.shape_cast %16 : vector<1x96xi1> to vector<1x96xi1>
    %243 = vector.broadcast %242 : vector<1x96xi1> to vector<3x96xi1>
    %244 = arith.select %243, %240, %241 : vector<3x96xi1>, vector<3x96xf32>
    %cst_53 = arith.constant dense<0.000000e+00> : vector<3x96xf32>
    %245 = tpu.matmul %239, %1, %cst_53 {dimension_numbers = #tpu.dot_dimension_numbers<[1], [0], [0], [1], [0, 0, 1, 1], [], []>} : vector<3x32xf32>, vector<32x96xf32>, vector<3x96xf32> -> vector<3x96xf32>
    %246 = vector.broadcast %5 : vector<1x96xf32> to vector<3x96xf32>
    %247 = arith.addf %245, %246 : vector<3x96xf32>
    %248 = vector.extract_strided_slice %244 {offsets = [0, 0], sizes = [3, 32], strides = [1, 1]} : vector<3x96xf32> to vector<3x32xf32>
    %249 = vector.extract_strided_slice %247 {offsets = [0, 0], sizes = [3, 32], strides = [1, 1]} : vector<3x96xf32> to vector<3x32xf32>
    %250 = arith.addf %248, %249 : vector<3x32xf32>
    %251 = arith.negf %250 : vector<3x32xf32>
    %252 = math.exp %251 : vector<3x32xf32>
    %cst_54 = arith.constant 1.000000e+00 : f32
    %253 = vector.broadcast %cst_54 : f32 to vector<3x32xf32>
    %254 = arith.addf %253, %252 : vector<3x32xf32>
    %255 = arith.divf %253, %254 : vector<3x32xf32>
    %256 = vector.extract_strided_slice %244 {offsets = [0, 32], sizes = [3, 32], strides = [1, 1]} : vector<3x96xf32> to vector<3x32xf32>
    %257 = vector.extract_strided_slice %247 {offsets = [0, 32], sizes = [3, 32], strides = [1, 1]} : vector<3x96xf32> to vector<3x32xf32>
    %258 = arith.addf %256, %257 : vector<3x32xf32>
    %259 = arith.negf %258 : vector<3x32xf32>
    %260 = math.exp %259 : vector<3x32xf32>
    %cst_55 = arith.constant 1.000000e+00 : f32
    %261 = vector.broadcast %cst_55 : f32 to vector<3x32xf32>
    %262 = arith.addf %261, %260 : vector<3x32xf32>
    %263 = arith.divf %261, %262 : vector<3x32xf32>
    %264 = vector.extract_strided_slice %244 {offsets = [0, 64], sizes = [3, 32], strides = [1, 1]} : vector<3x96xf32> to vector<3x32xf32>
    %265 = vector.extract_strided_slice %247 {offsets = [0, 64], sizes = [3, 32], strides = [1, 1]} : vector<3x96xf32> to vector<3x32xf32>
    %266 = arith.mulf %255, %265 : vector<3x32xf32>
    %267 = arith.addf %264, %266 : vector<3x32xf32>
    %268 = math.tanh %267 : vector<3x32xf32>
    %c6 = arith.constant 6 : index
    %c0_56 = arith.constant 0 : index
    %c0_57 = arith.constant 0 : index
    %269 = vector.load %arg1[%c6, %c0_56, %c0_57] : memref<8x3x32xf32, #tpu.memory_space<vmem>>, vector<1x3x32xf32>
    %270 = vector.shape_cast %269 : vector<1x3x32xf32> to vector<3x32xf32>
    %cst_58 = arith.constant 1.000000e+00 : f32
    %271 = vector.broadcast %cst_58 : f32 to vector<3x32xf32>
    %272 = arith.subf %271, %263 : vector<3x32xf32>
    %273 = arith.mulf %270, %272 : vector<3x32xf32>
    %274 = arith.subf %268, %239 : vector<3x32xf32>
    %275 = arith.mulf %273, %274 : vector<3x32xf32>
    %276 = arith.addf %239, %275 : vector<3x32xf32>
    %277 = vector.extract_strided_slice %11 {offsets = [21, 0], sizes = [3, 96], strides = [1, 1]} : vector<24x96xf32> to vector<3x96xf32>
    %278 = vector.extract_strided_slice %11 {offsets = [0, 0], sizes = [3, 96], strides = [1, 1]} : vector<24x96xf32> to vector<3x96xf32>
    %279 = vector.shape_cast %16 : vector<1x96xi1> to vector<1x96xi1>
    %280 = vector.broadcast %279 : vector<1x96xi1> to vector<3x96xi1>
    %281 = arith.select %280, %277, %278 : vector<3x96xi1>, vector<3x96xf32>
    %cst_59 = arith.constant dense<0.000000e+00> : vector<3x96xf32>
    %282 = tpu.matmul %276, %1, %cst_59 {dimension_numbers = #tpu.dot_dimension_numbers<[1], [0], [0], [1], [0, 0, 1, 1], [], []>} : vector<3x32xf32>, vector<32x96xf32>, vector<3x96xf32> -> vector<3x96xf32>
    %283 = vector.broadcast %5 : vector<1x96xf32> to vector<3x96xf32>
    %284 = arith.addf %282, %283 : vector<3x96xf32>
    %285 = vector.extract_strided_slice %281 {offsets = [0, 0], sizes = [3, 32], strides = [1, 1]} : vector<3x96xf32> to vector<3x32xf32>
    %286 = vector.extract_strided_slice %284 {offsets = [0, 0], sizes = [3, 32], strides = [1, 1]} : vector<3x96xf32> to vector<3x32xf32>
    %287 = arith.addf %285, %286 : vector<3x32xf32>
    %288 = arith.negf %287 : vector<3x32xf32>
    %289 = math.exp %288 : vector<3x32xf32>
    %cst_60 = arith.constant 1.000000e+00 : f32
    %290 = vector.broadcast %cst_60 : f32 to vector<3x32xf32>
    %291 = arith.addf %290, %289 : vector<3x32xf32>
    %292 = arith.divf %290, %291 : vector<3x32xf32>
    %293 = vector.extract_strided_slice %281 {offsets = [0, 32], sizes = [3, 32], strides = [1, 1]} : vector<3x96xf32> to vector<3x32xf32>
    %294 = vector.extract_strided_slice %284 {offsets = [0, 32], sizes = [3, 32], strides = [1, 1]} : vector<3x96xf32> to vector<3x32xf32>
    %295 = arith.addf %293, %294 : vector<3x32xf32>
    %296 = arith.negf %295 : vector<3x32xf32>
    %297 = math.exp %296 : vector<3x32xf32>
    %cst_61 = arith.constant 1.000000e+00 : f32
    %298 = vector.broadcast %cst_61 : f32 to vector<3x32xf32>
    %299 = arith.addf %298, %297 : vector<3x32xf32>
    %300 = arith.divf %298, %299 : vector<3x32xf32>
    %301 = vector.extract_strided_slice %281 {offsets = [0, 64], sizes = [3, 32], strides = [1, 1]} : vector<3x96xf32> to vector<3x32xf32>
    %302 = vector.extract_strided_slice %284 {offsets = [0, 64], sizes = [3, 32], strides = [1, 1]} : vector<3x96xf32> to vector<3x32xf32>
    %303 = arith.mulf %292, %302 : vector<3x32xf32>
    %304 = arith.addf %301, %303 : vector<3x32xf32>
    %305 = math.tanh %304 : vector<3x32xf32>
    %c7 = arith.constant 7 : index
    %c0_62 = arith.constant 0 : index
    %c0_63 = arith.constant 0 : index
    %306 = vector.load %arg1[%c7, %c0_62, %c0_63] : memref<8x3x32xf32, #tpu.memory_space<vmem>>, vector<1x3x32xf32>
    %307 = vector.shape_cast %306 : vector<1x3x32xf32> to vector<3x32xf32>
    %cst_64 = arith.constant 1.000000e+00 : f32
    %308 = vector.broadcast %cst_64 : f32 to vector<3x32xf32>
    %309 = arith.subf %308, %300 : vector<3x32xf32>
    %310 = arith.mulf %307, %309 : vector<3x32xf32>
    %311 = arith.subf %305, %276 : vector<3x32xf32>
    %312 = arith.mulf %310, %311 : vector<3x32xf32>
    %313 = arith.addf %276, %312 : vector<3x32xf32>
    %cst_65 = arith.constant dense<0.000000e+00> : vector<32xf32>
    %314 = vector.multi_reduction <add>, %313, %cst_65 [0] : vector<3x32xf32> to vector<32xf32>
    %315 = vector.shape_cast %314 : vector<32xf32> to vector<1x32xf32>
    %cst_66 = arith.constant 3.000000e+00 : f32
    %316 = vector.broadcast %cst_66 : f32 to vector<1x32xf32>
    %317 = arith.divf %315, %316 : vector<1x32xf32>
    %cst_67 = arith.constant dense<0.000000e+00> : vector<1x32xf32>
    %318 = tpu.matmul %317, %2, %cst_67 {dimension_numbers = #tpu.dot_dimension_numbers<[1], [0], [0], [1], [0, 0, 1, 1], [], []>} : vector<1x32xf32>, vector<32x32xf32>, vector<1x32xf32> -> vector<1x32xf32>
    %319 = arith.addf %318, %6 : vector<1x32xf32>
    %cst_68 = arith.constant 0.000000e+00 : f32
    %320 = vector.broadcast %cst_68 : f32 to vector<1x32xf32>
    %321 = arith.maximumf %319, %320 : vector<1x32xf32>
    %cst_69 = arith.constant dense<0.000000e+00> : vector<1x2xf32>
    %322 = tpu.matmul %321, %3, %cst_69 {dimension_numbers = #tpu.dot_dimension_numbers<[1], [0], [0], [1], [0, 0, 1, 1], [], []>} : vector<1x32xf32>, vector<32x2xf32>, vector<1x2xf32> -> vector<1x2xf32>
    %323 = arith.addf %322, %7 : vector<1x2xf32>
    %c0_70 = arith.constant 0 : index
    %c0_71 = arith.constant 0 : index
    %324 = vector.load %arg4[%c0_70, %c0_71] : memref<1x2xf32, #tpu.memory_space<vmem>>, vector<1x2xf32>
    tpu.vector_store %arg4[%c0_70, %c0_71], %323 {strides = array<i32>} : memref<1x2xf32, #tpu.memory_space<vmem>>, vector<1x2xf32>,
    return
  }
}

</mosaic_0001>

<bundles_post_ra>
// kernel: text_classifier_forward.1
= control target key start
LH: loop header
LB: loop body
LE: loop exit
PB: predicated region body
PF: predicated region fallthrough
CT: control target
= control target key end

     0   :  { %v1629_v2 = vmov 0.0   ;;  %s1997_s0 = inlined_call_operand.vmem [shape: f32[24,32], index: 0, kind: input, shape index: {}]   ;;  %s1998_s1 = inlined_call_operand.vmem [shape: f32[8,3,32], index: 1, kind: input, shape index: {}]   ;;  %s1999_s2 = inlined_call_operand.vmem [shape: f32[64,128], index: 2, kind: input, shape index: {}]   ;;  %s2000_s3 = inlined_call_operand.vmem [shape: f32[8,128], index: 3, kind: input, shape index: {}]   ;;  %s2001_s4 = inlined_call_operand.hbm [shape: f32[1,2], index: 4, kind: output, shape index: {}]  }
   0x1   :  { %v1663_v0 = vld [vmem:[%s1999_s2 + $0x18] sm:$0xff]  ;;  %1414 = vmatprep.subr.mxu0 %v1629_v2  ;;  %1431 = vmatprep.subr.mxu1 %v1629_v2  ;;  %v1675_v3 = vld [vmem:[%s1999_s2 + $0x10] sm:$0xff]  ;;  %v1689_v5 = vld [vmem:[%s1999_s2 + $0x8] sm:$0xff] }
   0x2   :  { %v1668_v1 = vld [vmem:[%s1999_s2 + $0x38] sm:$0xff]  ;;  %v1680_v4 = vld [vmem:[%s1999_s2 + $0x30] sm:$0xff]  ;;  %1415 = vmatpush3.msra.mxu0 %v1663_v0  ;;  %v1694_v6 = vld [vmem:[%s1999_s2 + $0x28] sm:$0xff] }
   0x3   :  { %1432 = vmatpush3.msra.mxu1 %v1668_v1  ;;  %1416 = vmatprep.subr.mxu0 %v1629_v2 }
   0x4   :  { %1433 = vmatprep.subr.mxu1 %v1629_v2  ;;  %1417 = vmatpush3.msra.mxu0 %v1675_v3 }
   0x5   :  { %1434 = vmatpush3.msra.mxu1 %v1680_v4 }
   0x6   :  { %9 = vsyncpa [#allocation3], 0  ;;  %1418 = vmatprep.subr.mxu0 %v1629_v2  ;;  %1435 = vmatprep.subr.mxu1 %v1629_v2  ;;  %v1703_v7 = vld [vmem:[%s1999_s2] sm:$0xff]  ;;  %vm37_vm0 = vcmask 261120   ;;  %vm1630_vm1 = vmmov 0   ;;  %v31_v10 = vld [vmem:[%s1997_s0 + $0x8] sm:$0xff]  ;;  %v127_v12 = vlaneseq }
   0x7   :  { %1419 = vmatpush3.msra.mxu0 %v1689_v5  ;;  %1436 = vmatpush3.msra.mxu1 %v1694_v6  ;;  %v1710_v8 = vld [vmem:[%s1999_s2 + $0x20] sm:$0xff]  ;;  %v32_v11 = vld [vmem:[%s1997_s0 + $0x10] sm:$0xff]  ;;  %s1631_s13 = smov 64   ;;  %vm743_vm2 = vcmask 1040384   ;;  %vm363_vm4 = vcmask 1046528   ;;  %s1632_s14 = smov 96  }
   0x8   :  { %1420 = vmatprep.subr.mxu0 %v1629_v2  ;;  %1437 = vmatprep.subr.mxu1 %v1629_v2  ;;  %v30_v9 = vld [vmem:[%s1997_s0] sm:$0xff]  ;;  %v128_v14 = vand.u32 127, %v127_v12  ;;  %vm484_vm5 = vcmask 1041408   ;;  %s1633_s29 = smov 32   ;;  %vm1121_vm6 = vcmask 256000   ;;  %s1634_s8 = smov [#allocation2]  }
   0x9   :  { %1421 = vmatpush3.msra.mxu0 %v1703_v7  ;;  %1422 = vmatprep.mubr.msk.f32.mxu0 %vm1630_vm1, %v1629_v2  ;;  %v1762_v13 = vld [vmem:[%s2000_s3 + $0x1] ss:$0 sm:$0xff]  ;;  %v1326_v17 = vld [vmem:[%s2000_s3] ss:$0 sm:$0xff]  ;;  %s1318_s9 = sshll.u32 %s1634_s8, 4  ;;  %vm1310_vm7 = vcmask 8192   ;;  %s1319_s9 = int_to_ptr.vmem [resolvable:$true] %s1318_s9 }
   0xa   :  { %1438 = vmatpush3.msra.mxu1 %v1710_v8  ;;  %1439 = vmatprep.mubr.msk.f32.mxu1 %vm1630_vm1, %v1629_v2  ;;  %v129_v22 = vand.u32 31, %v128_v14  ;;  %v232_v63 = vld [vmem:[%s1998_s1] sm:$0x7]  ;;  %s1607_s0 = scalar_lea.vmem %s1319_s9, 16  ;;  %s1611_s10 = scalar_lea.vmem %s1319_s9, 32 }
   0xb   :  { %1423 = vmatmul.mubr.msk.f32.vlgmr.msra.gmra.mxu0 %vm37_vm0, %v30_v9  ;;  %1440 = vmatmul.mubr.f32.vlgmr.msra.gmra.mxu1 %v1629_v2  ;;  %p1608_p0 = scmp.ne.s32.totalorder %s1319_s9, %s1607_s0  ;;  %p1612_p1 = scmp.lt.s32.totalorder %s1319_s9, %s1319_s9 }
   0xc   :  { %1425 = vmatprep.mubr.msk.f32.mxu0 %vm1630_vm1, %v1629_v2  ;;  %1442 = vmatprep.subr.mxu1 %v1629_v2  ;;  %vm1769_vm3 = vcmp.lt.s32.totalorder %v129_v22, 16  ;;  %p1613_p2 = scmp.lt.s32.totalorder %s1611_s10, %s1607_s0 }
   0xd   :  { %1443 = vmatpush3.msra.mxu1 %v1668_v1  ;;  %1450 = vmatprep.mubr.msk.f32.mxu1 %vm1630_vm1, %v1629_v2 }
   0xe   :  { %1444 = vmatprep.subr.mxu1 %v1629_v2  ;;  %1453 = vmatprep.subr.mxu0 %v1629_v2  ;;  %p1614_p3 = por %p1613_p2, %p1612_p1 }
   0xf   :  { %1426 = vmatmul.mubr.msk.f32.gmra.mxu0 %vm37_vm0, %v31_v10  ;;  %1445 = vmatpush3.msra.mxu1 %v1680_v4 }
  0x10   :  { %1428 = vmatprep.mubr.msk.f32.mxu0 %vm1630_vm1, %v1629_v2  ;;  %1446 = vmatprep.subr.mxu1 %v1629_v2  ;;  %p1615_p4 = pnand %p1614_p3, %p1608_p0 }
  0x11   :  { %1447 = vmatpush3.msra.mxu1 %v1694_v6  ;;  %1454 = vmatpush3.msra.mxu0 %v1668_v1 }
  0x12   :  { %1448 = vmatprep.subr.mxu1 %v1629_v2  ;;  %1455 = vmatprep.subr.mxu0 %v1629_v2 }
  0x13   :  { %1429 = vmatmul.mubr.msk.f32.gmra.mxu0 %vm37_vm0, %v32_v11  ;;  %1449 = vmatpush3.msra.mxu1 %v1710_v8 }
  0x14   :  { %1456 = vmatpush3.msra.mxu0 %v1680_v4  ;;  %1461 = vmatprep.mubr.msk.f32.mxu0 %vm1630_vm1, %v1629_v2 }
  0x15   :  { %1457 = vmatprep.subr.mxu0 %v1629_v2  ;;  %1464 = vmatprep.subr.mxu1 %v1629_v2 }
  0x16   :  { %1458 = vmatpush3.msra.mxu0 %v1694_v6 }
  0x17   :  { %1459 = vmatprep.subr.mxu0 %v1629_v2 }
  0x18   :  { %1460 = vmatpush3.msra.mxu0 %v1710_v8 }
  0x19   :  { %1475 = vmatprep.subr.mxu0 %v1629_v2 }
  0xcb   :  { %v113_v15 = vpop.f32.mrf.mxu0  ;;  %v210_v16 = vpop.f32.mrf.mxu1 }
  0xcc   :  { %v211_v18 = vadd.f32 %v1762_v13, %v210_v16  ;;  %v114_v19 = vadd.f32 %v1326_v17, %v113_v15 }
  0xcd   :  { %v1424_v20 = vpop.f32.mrf.mxu0  ;;  %v1441_v21 = vpop.f32.mrf.mxu1 }
  0xce   :  { %222 = vrot.lane.b32.xlu0 %v211_v18, %s1631_s13  ;;  %v744_v24 = vrot.slane %v114_v19, 7  ;;  %v887_v34 = vrot.slane %v114_v19, 1  ;;  %v1004_v35 = vrot.slane %v114_v19, 3 }
  0xcf   :  { %v118_v23 = vpop.f32.mrf.mxu0 }
  0xd0   :  { %v119_v25 = vadd.f32 %v1326_v17, %v118_v23 }
  0xd1   :  { %v1427_v26 = vpop.f32.mrf.mxu0 }
  0xd2   :  { %v508_v28 = vrot.slane %v119_v25, 3  ;;  %v625_v29 = vrot.slane %v119_v25, 5  ;;  %v745_v30 = vrot.slane %v119_v25, 7  ;;  %v364_v32 = vrot.slane %v119_v25, 1 }
  0xd3   :  { %v123_v31 = vpop.f32.mrf.mxu0  ;;  %v1775_v33 = vsel %vm1769_vm3, %v119_v25, %v744_v24 }
  0xd4   :  { %v124_v36 = vadd.f32 %v1326_v17, %v123_v31  ;;  %v1779_v37 = vsel %vm1769_vm3, %v119_v25, %v508_v28  ;;  %v1783_v38 = vsel %vm1769_vm3, %v119_v25, %v625_v29  ;;  %v746_v39 = vsel %vm743_vm2, %v744_v24, %v745_v30 }
  0xd5   :  { %v1430_v40 = vpop.f32.mrf.mxu0 }
  0xd6   :  { %v134_v41 = vrot.slane %v124_v36, 5  ;;  %v245_v42 = vrot.slane %v124_v36, 7  ;;  %v365_v43 = vrot.slane %v124_v36, 1  ;;  %v1788_v44 = vsel %vm1769_vm3, %v124_v36, %v746_v39 }
  0xd7   :  { %v1792_v45 = vsel %vm1769_vm3, %v124_v36, %v887_v34  ;;  %v1796_v46 = vsel %vm1769_vm3, %v124_v36, %v1004_v35  ;;  %v1334_v35 = vld [vmem:[%s1998_s1 + $0x4] sm:$0x7] }
  0xd8   :  { %v136_v47 = vsel %vm1769_vm3, %v114_v19, %v134_v41  ;;  %v247_v48 = vsel %vm1769_vm3, %v114_v19, %v245_v42  ;;  %v366_v49 = vsel %vm363_vm4, %v364_v32, %v365_v43  ;;  %v1804_v50 = vsel %vm1769_vm3, %v119_v25, %v365_v43 }
  0xd9   :  { %v214_v51 = vadd.f32 %v211_v18, %v136_v47  ;;  %v1808_v52 = vsel %vm1769_vm3, %v114_v19, %v366_v49 }
  0xdb   :  { %v1331_v53 = vmul.f32 -1.442695, %v214_v51 }
  0xdd   :  { %1547 = vpow2.f32 %v1331_v53 }
  0xea   :  { %v1548_v54 = vpop.eup %1547 }
  0xeb   :  { %v218_v55 = vadd.f32 1.0, %v1548_v54 }
  0xed   :  { %1549 = vrcp.f32 %v218_v55 }
  0xfa   :  { %v1550_v56 = vpop.eup %1549 }
  0xfb   :  { %v233_v57 = vsub.f32 1.0, %v1550_v56 }
  0xfd   :  { %235 = vrot.lane.b32.xlu1 %v233_v57, %s1632_s14 }
 0x140   :  { %v223_v58 = vpop.permute.xlu0 %222 }
 0x141   :  { %v225_v59 = vmul.f32 %v1550_v56, %v223_v58 }
 0x143   :  { %227 = vrot.lane.b32.xlu0 %v225_v59, %s1631_s13 }
 0x16f   :  { %v236_v9 = vpop.permute.xlu1 %235 }
 0x170   :  { %v238_v10 = vmul.f32 %v236_v9, %v232_v63 }
 0x1b5   :  { %v228_v60 = vpop.permute.xlu0 %227 }
 0x1b6   :  { %v230_v61 = vadd.f32 %v228_v60, %v136_v47 }
 0x1b8   :  { %1551 = vtanh.f32 %v230_v61 }
 0x1c5   :  { %v1552_v62 = vpop.eup %1551 }
 0x1c6   :  { %240 = vrot.lane.b32.xlu1 %v1552_v62, %s1631_s13 }
 0x238   :  { %v241_v11 = vpop.permute.xlu1 %240 }
 0x239   :  { %v243_v12 = vmul.f32 %v241_v11, %v238_v10 }
 0x23b   :  { %1451 = vmatmul.mubr.msk.f32.vlgmr.msra.gmra.mxu1 %vm37_vm0, %v243_v12  ;;  %v350_v18 = vrot.slane %v243_v12, 5 }
 0x23c   :  { %1465 = vmatpush3.msra.mxu1 %v1668_v1  ;;  %1472 = vmatprep.mubr.msk.f32.mxu1 %vm1630_vm1, %v1629_v2 }
 0x23d   :  { %1466 = vmatprep.subr.mxu1 %v1629_v2 }
 0x23e   :  { %1467 = vmatpush3.msra.mxu1 %v1680_v4 }
 0x23f   :  { %1468 = vmatprep.subr.mxu1 %v1629_v2 }
 0x240   :  { %1469 = vmatpush3.msra.mxu1 %v1694_v6 }
 0x241   :  { %1470 = vmatprep.subr.mxu1 %v1629_v2 }
 0x242   :  { %1471 = vmatpush3.msra.mxu1 %v1710_v8 }
 0x243   :  { %1486 = vmatprep.subr.mxu1 %v1629_v2 }
 0x2fb   :  { %v317_v14 = vpop.f32.mrf.mxu1 }
 0x2fc   :  { %v318_v15 = vadd.f32 %v1762_v13, %v317_v14 }
 0x2fd   :  { %v1452_v16 = vpop.f32.mrf.mxu1 }
 0x2fe   :  { %v322_v17 = vrot.slane %v318_v15, 5 }
 0x300   :  { %331 = vrot.lane.b32.xlu0 %v322_v17, %s1631_s13  ;;  %v324_v19 = vadd.f32 %v322_v17, %v247_v48 }
 0x302   :  { %v1333_v20 = vmul.f32 -1.442695, %v324_v19 }
 0x304   :  { %351 = vrot.lane.b32.xlu0 %v350_v18, %s1631_s13  ;;  %1553 = vpow2.f32 %v1333_v20 }
 0x311   :  { %v1554_v21 = vpop.eup %1553 }
 0x312   :  { %v328_v22 = vadd.f32 1.0, %v1554_v21 }
 0x314   :  { %1555 = vrcp.f32 %v328_v22 }
 0x321   :  { %v1556_v23 = vpop.eup %1555 }
 0x322   :  { %v343_v26 = vsub.f32 1.0, %v1556_v23 }
 0x324   :  { %v345_v27 = vrot.slane %v343_v26, 3 }
 0x372   :  { %v332_v24 = vpop.permute.xlu0 %331 }
 0x373   :  { %v334_v25 = vmul.f32 %v1556_v23, %v332_v24 }
 0x375   :  { %336 = vrot.lane.b32.xlu1 %v334_v25, %s1631_s13 }
 0x376   :  { %v352_v31 = vpop.permute.xlu0 %351 }
 0x379   :  { %346 = vrot.lane.b32.xlu1 %v345_v27, %s1632_s14 }
 0x3e7   :  { %v337_v28 = vpop.permute.xlu1 %336 }
 0x3e8   :  { %v339_v29 = vadd.f32 %v337_v28, %v247_v48 }
 0x3ea   :  { %1557 = vtanh.f32 %v339_v29  ;;  %v1338_v29 = vld [vmem:[%s1998_s1 + $0x8] sm:$0x7] }
 0x3eb   :  { %v347_v36 = vpop.permute.xlu1 %346 }
 0x3ec   :  { %v349_v39 = vmul.f32 %v1334_v35, %v347_v36 }
 0x3f7   :  { %v1558_v30 = vpop.eup %1557 }
 0x3f8   :  { %v354_v32 = vsub.f32 %v1558_v30, %v352_v31 }
 0x3fa   :  { %v356_v34 = vrot.slane %v354_v32, 3 }
 0x3fc   :  { %357 = vrot.lane.b32.xlu0 %v356_v34, %s1631_s13 }
 0x46e   :  { %v358_v40 = vpop.permute.xlu0 %357 }
 0x46f   :  { %v360_v41 = vmul.f32 %v358_v40, %v349_v39 }
 0x471   :  { %v1836_v42 = vadd.f32 %v360_v41, %v243_v12 }
 0x473   :  { %1462 = vmatmul.mubr.msk.f32.vlgmr.msra.gmra.mxu0 %vm37_vm0, %v1836_v42  ;;  %v492_v15 = vrot.slane %v1836_v42, 2 }
 0x474   :  { %1476 = vmatpush3.msra.mxu0 %v1668_v1  ;;  %1483 = vmatprep.mubr.msk.f32.mxu0 %vm1630_vm1, %v1629_v2 }
 0x475   :  { %1477 = vmatprep.subr.mxu0 %v1629_v2 }
 0x476   :  { %1478 = vmatpush3.msra.mxu0 %v1680_v4 }
 0x477   :  { %1479 = vmatprep.subr.mxu0 %v1629_v2 }
 0x478   :  { %1480 = vmatpush3.msra.mxu0 %v1694_v6 }
 0x479   :  { %1481 = vmatprep.subr.mxu0 %v1629_v2 }
 0x47a   :  { %1482 = vmatpush3.msra.mxu0 %v1710_v8 }
 0x47b   :  { %1497 = vmatprep.subr.mxu0 %v1629_v2 }
 0x533   :  { %v440_v43 = vpop.f32.mrf.mxu0 }
 0x534   :  { %v441_v47 = vadd.f32 %v1762_v13, %v440_v43 }
 0x535   :  { %v1463_v48 = vpop.f32.mrf.mxu0 }
 0x536   :  { %v445_v49 = vrot.slane %v441_v47, 2 }
 0x538   :  { %461 = vrot.lane.b32.xlu1 %v445_v49, %s1631_s13  ;;  %v447_v51 = vadd.f32 %v445_v49, %v1808_v52  ;;  %v448_v53 = vadd.f32 %v445_v49, %v1804_v50 }
 0x53a   :  { %v1336_v54 = vmul.f32 -1.442695, %v447_v51  ;;  %v1337_v55 = vmul.f32 -1.442695, %v448_v53 }
 0x53c   :  { %1559 = vpow2.f32 %v1336_v54 }
 0x53d   :  { %1561 = vpow2.f32 %v1337_v55 }
 0x549   :  { %v1560_v56 = vpop.eup %1559 }
 0x54a   :  { %v1562_v57 = vpop.eup %1561  ;;  %v455_v58 = vadd.f32 1.0, %v1560_v56 }
 0x54b   :  { %v456_v59 = vadd.f32 1.0, %v1562_v57 }
 0x54c   :  { %1563 = vrcp.f32 %v455_v58 }
 0x54d   :  { %1565 = vrcp.f32 %v456_v59 }
 0x559   :  { %v1564_v60 = vpop.eup %1563 }
 0x55a   :  { %v1566_v61 = vpop.eup %1565  ;;  %v480_v62 = vsub.f32 1.0, %v1564_v60 }
 0x55b   :  { %v481_v63 = vsub.f32 1.0, %v1566_v61 }
 0x55c   :  { %v485_v12 = vrot.slane %v480_v62, 6 }
 0x55d   :  { %v486_v14 = vrot.slane %v481_v63, 6 }
 0x55f   :  { %v487_v16 = vsel %vm484_vm5, %v485_v12, %v486_v14 }
 0x5aa   :  { %v462_v9 = vpop.permute.xlu1 %461 }
 0x5ab   :  { %v464_v10 = vmul.f32 %v1564_v60, %v462_v9  ;;  %v465_v11 = vmul.f32 %v1566_v61, %v462_v9  ;;  %v1341_v61 = vld [vmem:[%s1998_s1 + $0xc] sm:$0x7] }
 0x5ad   :  { %470 = vrot.lane.b32.xlu1 %v465_v11, %s1631_s13  ;;  %468 = vrot.lane.b32.xlu0 %v464_v10, %s1631_s13 }
 0x5b1   :  { %488 = vrot.lane.b32.xlu1 %v487_v16, %s1632_s14  ;;  %493 = vrot.lane.b32.xlu0 %v492_v15, %s1631_s13 }
 0x61f   :  { %v471_v17 = vpop.permute.xlu1 %470  ;;  %v469_v18 = vpop.permute.xlu0 %468 }
 0x620   :  { %v475_v19 = vadd.f32 %v471_v17, %v1804_v50  ;;  %v474_v20 = vadd.f32 %v469_v18, %v1808_v52 }
 0x622   :  { %1567 = vtanh.f32 %v475_v19 }
 0x623   :  { %1569 = vtanh.f32 %v474_v20  ;;  %v494_v22 = vpop.permute.xlu0 %493  ;;  %v489_v50 = vpop.permute.xlu1 %488 }
 0x624   :  { %v491_v30 = vmul.f32 %v1338_v29, %v489_v50 }
 0x62f   :  { %v1568_v21 = vpop.eup %1567 }
 0x630   :  { %v1570_v23 = vpop.eup %1569  ;;  %v497_v24 = vsub.f32 %v1568_v21, %v494_v22 }
 0x631   :  { %v496_v25 = vsub.f32 %v1570_v23, %v494_v22 }
 0x632   :  { %v501_v26 = vrot.slane %v497_v24, 6 }
 0x633   :  { %v500_v27 = vrot.slane %v496_v25, 6 }
 0x635   :  { %v502_v28 = vsel %vm484_vm5, %v500_v27, %v501_v26 }
 0x636   :  { %503 = vrot.lane.b32.xlu0 %v502_v28, %s1631_s13 }
 0x6a8   :  { %v504_v52 = vpop.permute.xlu0 %503 }
 0x6a9   :  { %v506_v31 = vmul.f32 %v504_v52, %v491_v30  ;;  %v1344_v52 = vld [vmem:[%s1998_s1 + $0x10] sm:$0x7] }
 0x6ab   :  { %v507_v32 = vadd.f32 %v506_v31, %v1836_v42 }
 0x6ad   :  { %1473 = vmatmul.mubr.msk.f32.vlgmr.msra.gmra.mxu1 %vm37_vm0, %v507_v32  ;;  %v613_v40 = vrot.slane %v507_v32, 7 }
 0x6ae   :  { %1487 = vmatpush3.msra.mxu1 %v1668_v1  ;;  %1494 = vmatprep.mubr.msk.f32.mxu1 %vm1630_vm1, %v1629_v2 }
 0x6af   :  { %1488 = vmatprep.subr.mxu1 %v1629_v2 }
 0x6b0   :  { %1489 = vmatpush3.msra.mxu1 %v1680_v4 }
 0x6b1   :  { %1490 = vmatprep.subr.mxu1 %v1629_v2 }
 0x6b2   :  { %1491 = vmatpush3.msra.mxu1 %v1694_v6 }
 0x6b3   :  { %1492 = vmatprep.subr.mxu1 %v1629_v2 }
 0x6b4   :  { %1493 = vmatpush3.msra.mxu1 %v1710_v8 }
 0x6b5   :  { %1508 = vmatprep.subr.mxu1 %v1629_v2 }
 0x76d   :  { %v580_v34 = vpop.f32.mrf.mxu1 }
 0x76e   :  { %v581_v35 = vadd.f32 %v1762_v13, %v580_v34 }
 0x76f   :  { %v1474_v36 = vpop.f32.mrf.mxu1 }
 0x770   :  { %v585_v39 = vrot.slane %v581_v35, 7 }
 0x772   :  { %594 = vrot.lane.b32.xlu1 %v585_v39, %s1631_s13  ;;  %v587_v41 = vadd.f32 %v585_v39, %v1779_v37 }
 0x774   :  { %v1340_v42 = vmul.f32 -1.442695, %v587_v41 }
 0x776   :  { %614 = vrot.lane.b32.xlu1 %v613_v40, %s1631_s13  ;;  %1571 = vpow2.f32 %v1340_v42 }
 0x783   :  { %v1572_v43 = vpop.eup %1571 }
 0x784   :  { %v591_v47 = vadd.f32 1.0, %v1572_v43 }
 0x786   :  { %1573 = vrcp.f32 %v591_v47 }
 0x793   :  { %v1574_v48 = vpop.eup %1573 }
 0x794   :  { %v606_v53 = vsub.f32 1.0, %v1574_v48 }
 0x796   :  { %v608_v54 = vrot.slane %v606_v53, 1 }
 0x7e4   :  { %v595_v49 = vpop.permute.xlu1 %594 }
 0x7e5   :  { %v597_v51 = vmul.f32 %v1574_v48, %v595_v49 }
 0x7e7   :  { %599 = vrot.lane.b32.xlu0 %v597_v51, %s1631_s13 }
 0x7e8   :  { %v615_v58 = vpop.permute.xlu1 %614 }
 0x7eb   :  { %609 = vrot.lane.b32.xlu0 %v608_v54, %s1632_s14 }
 0x859   :  { %v600_v55 = vpop.permute.xlu0 %599 }
 0x85a   :  { %v602_v56 = vadd.f32 %v600_v55, %v1779_v37 }
 0x85c   :  { %1575 = vtanh.f32 %v602_v56 }
 0x85d   :  { %v610_v62 = vpop.permute.xlu0 %609 }
 0x85e   :  { %v612_v63 = vmul.f32 %v1341_v61, %v610_v62 }
 0x869   :  { %v1576_v57 = vpop.eup %1575 }
 0x86a   :  { %v617_v59 = vsub.f32 %v1576_v57, %v615_v58 }
 0x86c   :  { %v619_v60 = vrot.slane %v617_v59, 1 }
 0x86e   :  { %620 = vrot.lane.b32.xlu1 %v619_v60, %s1631_s13 }
 0x8e0   :  { %v621_v9 = vpop.permute.xlu1 %620 }
 0x8e1   :  { %v623_v10 = vmul.f32 %v621_v9, %v612_v63 }
 0x8e3   :  { %v624_v11 = vadd.f32 %v623_v10, %v507_v32 }
 0x8e5   :  { %1484 = vmatmul.mubr.msk.f32.vlgmr.msra.gmra.mxu0 %vm37_vm0, %v624_v11  ;;  %v730_v16 = vrot.slane %v624_v11, 4 }
 0x8e6   :  { %1498 = vmatpush3.msra.mxu0 %v1668_v1  ;;  %1505 = vmatprep.mubr.msk.f32.mxu0 %vm1630_vm1, %v1629_v2 }
 0x8e7   :  { %1499 = vmatprep.subr.mxu0 %v1629_v2 }
 0x8e8   :  { %1500 = vmatpush3.msra.mxu0 %v1680_v4 }
 0x8e9   :  { %1501 = vmatprep.subr.mxu0 %v1629_v2 }
 0x8ea   :  { %1502 = vmatpush3.msra.mxu0 %v1694_v6 }
 0x8eb   :  { %1503 = vmatprep.subr.mxu0 %v1629_v2 }
 0x8ec   :  { %1504 = vmatpush3.msra.mxu0 %v1710_v8 }
 0x8ed   :  { %1519 = vmatprep.subr.mxu0 %v1629_v2 }
 0x9a5   :  { %v697_v37 = vpop.f32.mrf.mxu0 }
 0x9a6   :  { %v698_v12 = vadd.f32 %v1762_v13, %v697_v37 }
 0x9a7   :  { %v1485_v14 = vpop.f32.mrf.mxu0 }
 0x9a8   :  { %v702_v15 = vrot.slane %v698_v12, 4 }
 0x9aa   :  { %711 = vrot.lane.b32.xlu0 %v702_v15, %s1631_s13  ;;  %v704_v17 = vadd.f32 %v702_v15, %v1783_v38 }
 0x9ac   :  { %v1343_v18 = vmul.f32 -1.442695, %v704_v17 }
 0x9ae   :  { %731 = vrot.lane.b32.xlu0 %v730_v16, %s1631_s13  ;;  %1577 = vpow2.f32 %v1343_v18 }
 0x9bb   :  { %v1578_v19 = vpop.eup %1577 }
 0x9bc   :  { %v708_v20 = vadd.f32 1.0, %v1578_v19 }
 0x9be   :  { %1579 = vrcp.f32 %v708_v20 }
 0x9cb   :  { %v1580_v21 = vpop.eup %1579 }
 0x9cc   :  { %v723_v24 = vsub.f32 1.0, %v1580_v21 }
 0x9ce   :  { %v725_v25 = vrot.slane %v723_v24, 4 }
 0xa1c   :  { %v712_v22 = vpop.permute.xlu0 %711 }
 0xa1d   :  { %v714_v23 = vmul.f32 %v1580_v21, %v712_v22 }
 0xa1f   :  { %716 = vrot.lane.b32.xlu1 %v714_v23, %s1631_s13  ;;  %v1348_v23 = vld [vmem:[%s1998_s1 + $0x14] sm:$0x7] }
 0xa20   :  { %v732_v29 = vpop.permute.xlu0 %731 }
 0xa23   :  { %726 = vrot.lane.b32.xlu1 %v725_v25, %s1632_s14 }
 0xa91   :  { %v717_v26 = vpop.permute.xlu1 %716 }
 0xa92   :  { %v719_v27 = vadd.f32 %v717_v26, %v1783_v38 }
 0xa94   :  { %1581 = vtanh.f32 %v719_v27 }
 0xa95   :  { %v727_v31 = vpop.permute.xlu1 %726 }
 0xa96   :  { %v729_v32 = vmul.f32 %v1344_v52, %v727_v31 }
 0xaa1   :  { %v1582_v28 = vpop.eup %1581 }
 0xaa2   :  { %v734_v50 = vsub.f32 %v1582_v28, %v732_v29 }
 0xaa4   :  { %v736_v30 = vrot.slane %v734_v50, 4 }
 0xaa6   :  { %737 = vrot.lane.b32.xlu0 %v736_v30, %s1631_s13 }
 0xb18   :  { %v738_v34 = vpop.permute.xlu0 %737 }
 0xb19   :  { %v740_v35 = vmul.f32 %v738_v34, %v729_v32 }
 0xb1b   :  { %v1912_v36 = vadd.f32 %v740_v35, %v624_v11 }
 0xb1d   :  { %1495 = vmatmul.mubr.msk.f32.vlgmr.msra.gmra.mxu1 %vm37_vm0, %v1912_v36  ;;  %v871_v9 = vrot.slane %v1912_v36, 1 }
 0xb1e   :  { %1509 = vmatpush3.msra.mxu1 %v1668_v1  ;;  %1516 = vmatprep.mubr.msk.f32.mxu1 %vm1630_vm1, %v1629_v2 }
 0xb1f   :  { %1510 = vmatprep.subr.mxu1 %v1629_v2 }
 0xb20   :  { %1511 = vmatpush3.msra.mxu1 %v1680_v4 }
 0xb21   :  { %1512 = vmatprep.subr.mxu1 %v1629_v2 }
 0xb22   :  { %1513 = vmatpush3.msra.mxu1 %v1694_v6 }
 0xb23   :  { %1514 = vmatprep.subr.mxu1 %v1629_v2 }
 0xb24   :  { %1515 = vmatpush3.msra.mxu1 %v1710_v8 }
 0xb25   :  { %1530 = vmatprep.subr.mxu1 %v1629_v2 }
 0xbdd   :  { %v820_v38 = vpop.f32.mrf.mxu1 }
 0xbde   :  { %v821_v39 = vadd.f32 %v1762_v13, %v820_v38 }
 0xbdf   :  { %v1496_v40 = vpop.f32.mrf.mxu1 }
 0xbe0   :  { %v825_v41 = vrot.slane %v821_v39, 1 }
 0xbe2   :  { %841 = vrot.lane.b32.xlu1 %v825_v41, %s1631_s13  ;;  %v827_v42 = vadd.f32 %v825_v41, %v1775_v33  ;;  %v828_v43 = vadd.f32 %v825_v41, %v1788_v44 }
 0xbe4   :  { %v1346_v47 = vmul.f32 -1.442695, %v827_v42  ;;  %v1347_v48 = vmul.f32 -1.442695, %v828_v43 }
 0xbe6   :  { %1583 = vpow2.f32 %v1346_v47 }
 0xbe7   :  { %1585 = vpow2.f32 %v1347_v48 }
 0xbf3   :  { %v1584_v49 = vpop.eup %1583 }
 0xbf4   :  { %v1586_v51 = vpop.eup %1585  ;;  %v835_v53 = vadd.f32 1.0, %v1584_v49 }
 0xbf5   :  { %v836_v54 = vadd.f32 1.0, %v1586_v51  ;;  %v1351_v51 = vld [vmem:[%s1998_s1 + $0x18] sm:$0x7] }
 0xbf6   :  { %1587 = vrcp.f32 %v835_v53 }
 0xbf7   :  { %1589 = vrcp.f32 %v836_v54 }
 0xc03   :  { %v1588_v55 = vpop.eup %1587 }
 0xc04   :  { %v1590_v56 = vpop.eup %1589  ;;  %v860_v57 = vsub.f32 1.0, %v1588_v55 }
 0xc05   :  { %v861_v58 = vsub.f32 1.0, %v1590_v56 }
 0xc06   :  { %v864_v62 = vrot.slane %v860_v57, 7 }
 0xc07   :  { %v865_v63 = vrot.slane %v861_v58, 7 }
 0xc09   :  { %v866_v10 = vsel %vm743_vm2, %v864_v62, %v865_v63 }
 0xc54   :  { %v842_v59 = vpop.permute.xlu1 %841 }
 0xc55   :  { %v844_v60 = vmul.f32 %v1588_v55, %v842_v59  ;;  %v845_v61 = vmul.f32 %v1590_v56, %v842_v59 }
 0xc57   :  { %850 = vrot.lane.b32.xlu1 %v845_v61, %s1631_s13  ;;  %848 = vrot.lane.b32.xlu0 %v844_v60, %s1631_s13 }
 0xc5b   :  { %867 = vrot.lane.b32.xlu1 %v866_v10, %s1632_s14  ;;  %872 = vrot.lane.b32.xlu0 %v871_v9, %s1631_s13 }
 0xcc9   :  { %v851_v11 = vpop.permute.xlu1 %850  ;;  %v849_v37 = vpop.permute.xlu0 %848 }
 0xcca   :  { %v855_v12 = vadd.f32 %v851_v11, %v1788_v44  ;;  %v854_v14 = vadd.f32 %v849_v37, %v1775_v33 }
 0xccc   :  { %1591 = vtanh.f32 %v855_v12 }
 0xccd   :  { %1593 = vtanh.f32 %v854_v14  ;;  %v873_v16 = vpop.permute.xlu0 %872  ;;  %v868_v44 = vpop.permute.xlu1 %867 }
 0xcce   :  { %v870_v24 = vmul.f32 %v1348_v23, %v868_v44 }
 0xcd9   :  { %v1592_v15 = vpop.eup %1591 }
 0xcda   :  { %v1594_v17 = vpop.eup %1593  ;;  %v876_v18 = vsub.f32 %v1592_v15, %v873_v16 }
 0xcdb   :  { %v875_v19 = vsub.f32 %v1594_v17, %v873_v16 }
 0xcdc   :  { %v880_v20 = vrot.slane %v876_v18, 7 }
 0xcdd   :  { %v879_v21 = vrot.slane %v875_v19, 7 }
 0xcdf   :  { %v881_v22 = vsel %vm743_vm2, %v879_v21, %v880_v20 }
 0xce0   :  { %882 = vrot.lane.b32.xlu0 %v881_v22, %s1631_s13 }
 0xd52   :  { %v883_v33 = vpop.permute.xlu0 %882 }
 0xd53   :  { %v885_v25 = vmul.f32 %v883_v33, %v870_v24 }
 0xd55   :  { %v886_v26 = vadd.f32 %v885_v25, %v1912_v36 }
 0xd57   :  { %1506 = vmatmul.mubr.msk.f32.vlgmr.msra.gmra.mxu0 %vm37_vm0, %v886_v26  ;;  %v992_v30 = vrot.slane %v886_v26, 6 }
 0xd58   :  { %1527 = vmatprep.mubr.msk.f32.mxu0 %vm1630_vm1, %v1629_v2 }
 0xe17   :  { %v959_v27 = vpop.f32.mrf.mxu0 }
 0xe18   :  { %v960_v28 = vadd.f32 %v1762_v13, %v959_v27 }
 0xe19   :  { %v1507_v29 = vpop.f32.mrf.mxu0 }
 0xe1a   :  { %v964_v50 = vrot.slane %v960_v28, 6 }
 0xe1c   :  { %973 = vrot.lane.b32.xlu1 %v964_v50, %s1631_s13  ;;  %v966_v52 = vadd.f32 %v964_v50, %v1792_v45 }
 0xe1e   :  { %v1350_v31 = vmul.f32 -1.442695, %v966_v52  ;;  %v28_v52 = vld [vmem:[%s2000_s3 + $0x2] sm:$0x1] }
 0xe20   :  { %993 = vrot.lane.b32.xlu1 %v992_v30, %s1631_s13  ;;  %1595 = vpow2.f32 %v1350_v31 }
 0xe2d   :  { %v1596_v32 = vpop.eup %1595 }
 0xe2e   :  { %v970_v34 = vadd.f32 1.0, %v1596_v32 }
 0xe30   :  { %1597 = vrcp.f32 %v970_v34 }
 0xe3d   :  { %v1598_v35 = vpop.eup %1597 }
 0xe3e   :  { %v985_v39 = vsub.f32 1.0, %v1598_v35 }
 0xe40   :  { %v987_v40 = vrot.slane %v985_v39, 2 }
 0xe8e   :  { %v974_v36 = vpop.permute.xlu1 %973 }
 0xe8f   :  { %v976_v38 = vmul.f32 %v1598_v35, %v974_v36  ;;  %v29_v36 = vld [vmem:[%s2000_s3 + $0x3] sm:$0x1] }
 0xe91   :  { %978 = vrot.lane.b32.xlu0 %v976_v38, %s1631_s13 }
 0xe92   :  { %v994_v47 = vpop.permute.xlu1 %993 }
 0xe95   :  { %988 = vrot.lane.b32.xlu0 %v987_v40, %s1632_s14 }
 0xf03   :  { %v979_v41 = vpop.permute.xlu0 %978 }
 0xf04   :  { %v981_v42 = vadd.f32 %v979_v41, %v1792_v45 }
 0xf06   :  { %1599 = vtanh.f32 %v981_v42 }
 0xf07   :  { %v989_v53 = vpop.permute.xlu0 %988 }
 0xf08   :  { %v991_v54 = vmul.f32 %v1351_v51, %v989_v53 }
 0xf13   :  { %v1600_v43 = vpop.eup %1599 }
 0xf14   :  { %v996_v48 = vsub.f32 %v1600_v43, %v994_v47 }
 0xf16   :  { %v998_v49 = vrot.slane %v996_v48, 2 }
 0xf18   :  { %999 = vrot.lane.b32.xlu1 %v998_v49, %s1631_s13 }
 0xf8a   :  { %v1000_v55 = vpop.permute.xlu1 %999 }
 0xf8b   :  { %v1002_v56 = vmul.f32 %v1000_v55, %v991_v54 }
 0xf8d   :  { %v1003_v57 = vadd.f32 %v1002_v56, %v886_v26 }
 0xf8f   :  { %1517 = vmatmul.mubr.msk.f32.vlgmr.msra.gmra.mxu1 %vm37_vm0, %v1003_v57  ;;  %v1109_v61 = vrot.slane %v1003_v57, 3 }
 0xf90   :  { %1538 = vmatprep.mubr.msk.f32.mxu1 %vm1630_vm1, %v1629_v2 }
0x104f   :  { %v1076_v45 = vpop.f32.mrf.mxu1 }
0x1050   :  { %v1077_v58 = vadd.f32 %v1762_v13, %v1076_v45 }
0x1051   :  { %v1518_v59 = vpop.f32.mrf.mxu1 }
0x1052   :  { %v1081_v60 = vrot.slane %v1077_v58, 3 }
0x1054   :  { %1090 = vrot.lane.b32.xlu0 %v1081_v60, %s1631_s13  ;;  %v1083_v62 = vadd.f32 %v1081_v60, %v1796_v46 }
0x1056   :  { %v1353_v63 = vmul.f32 -1.442695, %v1083_v62 }
0x1058   :  { %1110 = vrot.lane.b32.xlu0 %v1109_v61, %s1631_s13  ;;  %1601 = vpow2.f32 %v1353_v63 }
0x1065   :  { %v1602_v9 = vpop.eup %1601 }
0x1066   :  { %v1087_v10 = vadd.f32 1.0, %v1602_v9 }
0x1068   :  { %1603 = vrcp.f32 %v1087_v10 }
0x1075   :  { %v1604_v11 = vpop.eup %1603 }
0x1076   :  { %v1102_v14 = vsub.f32 1.0, %v1604_v11 }
0x1078   :  { %v1104_v13 = vrot.slane %v1102_v14, 5 }
0x10c6   :  { %v1091_v37 = vpop.permute.xlu0 %1090 }
0x10c7   :  { %v1093_v12 = vmul.f32 %v1604_v11, %v1091_v37 }
0x10c9   :  { %1095 = vrot.lane.b32.xlu1 %v1093_v12, %s1631_s13 }
0x10ca   :  { %v1111_v19 = vpop.permute.xlu0 %1110 }
0x10cd   :  { %1105 = vrot.lane.b32.xlu1 %v1104_v13, %s1632_s14 }
0x10d1   :  { %1141 = vrot.lane.b32.xlu1 %v1663_v0, %s1633_s29 }
0x10d5   :  { %1137 = vrot.lane.b32.xlu1 %v1689_v5, %s1633_s29  ;;  %v1354_v5 = vld [vmem:[%s1998_s1 + $0x1c] sm:$0x7] }
0x10d9   :  { %1231 = vrot.lane.b32.xlu1 %v1668_v1, %s1633_s29 }
0x10dd   :  { %1227 = vrot.lane.b32.xlu1 %v1694_v6, %s1633_s29 }
0x113b   :  { %v1096_v15 = vpop.permute.xlu1 %1095 }
0x113c   :  { %v1098_v16 = vadd.f32 %v1096_v15, %v1796_v46 }
0x113e   :  { %1605 = vtanh.f32 %v1098_v16 }
0x113f   :  { %v1106_v17 = vpop.permute.xlu1 %1105 }
0x1140   :  { %v1108_v6 = vmul.f32 %v1354_v5, %v1106_v17 }
0x1143   :  { %v1142_v22 = vpop.permute.xlu1 %1141 }
0x1144   :  { %1520 = vmatpush3.msra.mxu0 %v1142_v22 }
0x1145   :  { %1521 = vmatprep.subr.mxu0 %v1629_v2 }
0x1147   :  { %v1138_v0 = vpop.permute.xlu1 %1137 }
0x114b   :  { %v1606_v18 = vpop.eup %1605  ;;  %v1232_v1 = vpop.permute.xlu1 %1231 }
0x114c   :  { %v1113_v20 = vsub.f32 %v1606_v18, %v1111_v19  ;;  %1531 = vmatpush3.msra.mxu1 %v1232_v1 }
0x114d   :  { %1532 = vmatprep.subr.mxu1 %v1629_v2 }
0x114e   :  { %v1115_v21 = vrot.slane %v1113_v20, 5 }
0x114f   :  { %v1228_v50 = vpop.permute.xlu1 %1227 }
0x1150   :  { %1116 = vrot.lane.b32.xlu0 %v1115_v21, %s1631_s13 }
0x1154   :  { %1139 = vrot.lane.b32.xlu0 %v1675_v3, %s1633_s29 }
0x1158   :  { %1135 = vrot.lane.b32.xlu0 %v1703_v7, %s1633_s29 }
0x115c   :  { %1229 = vrot.lane.b32.xlu0 %v1680_v4, %s1633_s29 }
0x1160   :  { %1225 = vrot.lane.b32.xlu0 %v1710_v8, %s1633_s29 }
0x11c2   :  { %v1117_v46 = vpop.permute.xlu0 %1116 }
0x11c3   :  { %v1119_v23 = vmul.f32 %v1117_v46, %v1108_v6 }
0x11c5   :  { %v1120_v44 = vadd.f32 %v1119_v23, %v1003_v57 }
0x11c6   :  { %v1140_v3 = vpop.permute.xlu0 %1139 }
0x11c7   :  { %v1122_v24 = vsel %vm1121_vm6, %v1120_v44, 0.0  ;;  %1522 = vmatpush3.msra.mxu0 %v1140_v3 }
0x11c8   :  { %v1123_v33 = vrot.slane %v1122_v24, 4  ;;  %1523 = vmatprep.subr.mxu0 %v1629_v2 }
0x11c9   :  { %1524 = vmatpush3.msra.mxu0 %v1138_v0 }
0x11ca   :  { %v1124_v7 = vadd.f32 %v1123_v33, %v1122_v24  ;;  %v1136_v4 = vpop.permute.xlu0 %1135  ;;  %1525 = vmatprep.subr.mxu0 %v1629_v2 }
0x11cb   :  { %1526 = vmatpush3.msra.mxu0 %v1136_v4 }
0x11cc   :  { %v1125_v8 = vrot.slane %v1124_v7, 2 }
0x11ce   :  { %v1126_v25 = vadd.f32 %v1125_v8, %v1124_v7  ;;  %v1230_v26 = vpop.permute.xlu0 %1229 }
0x11cf   :  { %1533 = vmatpush3.msra.mxu1 %v1230_v26 }
0x11d0   :  { %v1127_v27 = vrot.slane %v1126_v25, 1  ;;  %1534 = vmatprep.subr.mxu1 %v1629_v2 }
0x11d1   :  { %1535 = vmatpush3.msra.mxu1 %v1228_v50 }
0x11d2   :  { %v1128_v28 = vadd.f32 %v1127_v27, %v1126_v25  ;;  %v1226_v30 = vpop.permute.xlu0 %1225  ;;  %1536 = vmatprep.subr.mxu1 %v1629_v2 }
0x11d3   :  { %1537 = vmatpush3.msra.mxu1 %v1226_v30 }
0x11d4   :  { %v1130_v29 = vmul.f32 0.33333334, %v1128_v28 }
0x11d6   :  { %1528 = vmatmul.mubr.msk.f32.vlgmr.msra.gmra.mxu0 %vm37_vm0, %v1130_v29 }
0x1296   :  { %v1216_v31 = vpop.f32.mrf.mxu0 }
0x1297   :  { %v1217_v32 = vadd.f32 %v1216_v31, %v28_v52 }
0x1298   :  { %v1529_v34 = vpop.f32.mrf.mxu0 }
0x1299   :  { %v1220_v35 = vmax.f32 %v1217_v32, 0.0 }
0x129b   :  { %1539 = vmatmul.mubr.msk.f32.vlgmr.msra.gmra.mxu1 %vm37_vm0, %v1220_v35 }
0x135b   :  { %v1306_v38 = vpop.f32.mrf.mxu1 }
0x135c   :  { %v1307_v2 = vadd.f32 %v1306_v38, %v29_v36 }
0x135d   :  { %v1540_v39 = vpop.f32.mrf.mxu1 }
0x135e   :  { %1311 = vst.msk [vmem:[#allocation2] sm:$0x1] %vm1310_vm7, %v1307_v2 }
0x135f   :  { %1618 = shalt.err (!%p1615_p4)
}
0x1360   :  { %1321 = dma.vmem_to_hbm [thread:$0]  %s1319_s9, 16, %s2001_s4, [#allocation3]  }
0x1361   :  { %1627 = dma.done.wait [#allocation3], 16  }
0x1362   :  { %1628 = vsyncadd [#allocation3], 4294967280 }
0x1363   :  { %1325 = vsyncpa [#allocation3], 1 }

</bundles_post_ra>
